<compile_context>
chip_gen: v7x
topology: tpu7x:2x2x1
jax: 0.10.0
libtpu: 0.0.40
codegen_flags: <defaults>
</compile_context>

<pallas_src>
import functools
import math

import jax
import jax.numpy as jnp
from jax.experimental import pallas as pl
from jax.experimental.pallas import tpu as pltpu


# ----------------------------------------------------------------------------
# Fused Pallas kernel: grouper MLP + softmax + per-group reductions + regs
#
#   inputs : x (B,F) | small=[logits|loss|label] (B,C+2) | w1 w2 w3 | b1 b2 b3
#   outputs: gd (B,S)
#            stats (8,S) rows = [gloss, gcount, gacc, hard_cnt, group_losses,
#                                entropy_mean (bcast), marginal_kl (bcast), 0]
# ----------------------------------------------------------------------------
def _domino_fused_kernel(C, eps, x_ref, small_ref, w1_ref, w2_ref, w3_ref,
                         b1_ref, b2_ref, b3_ref, gd_ref, stats_ref):
    B = x_ref.shape[0]
    S = w3_ref.shape[1]

    x = x_ref[...]                                      # (B, F)
    small = small_ref[...]                              # (B, C+2)
    logits = small[:, 0:C]                              # (B, C)
    loss = small[:, C:C + 1]                            # (B, 1)
    labels = small[:, C + 1:C + 2]                      # (B, 1) float (exact for C<2^24)

    # grouper MLP: Linear(F,64)+ReLU -> Linear(64,32)+ReLU -> Linear(32,S)
    # bf16 MXU operands, f32 accumulation, f32 bias adds / ReLU (v5e-safe).
    h1 = jnp.maximum(
        jnp.dot(x.astype(jnp.bfloat16), w1_ref[...].astype(jnp.bfloat16),
                preferred_element_type=jnp.float32) + b1_ref[...], 0.0)
    h2 = jnp.maximum(
        jnp.dot(h1.astype(jnp.bfloat16), w2_ref[...].astype(jnp.bfloat16),
                preferred_element_type=jnp.float32) + b2_ref[...], 0.0)
    z = jnp.dot(h2.astype(jnp.bfloat16), w3_ref[...].astype(jnp.bfloat16),
                preferred_element_type=jnp.float32) + b3_ref[...]

    # exact softmax over dim=1
    m = jnp.max(z, axis=-1, keepdims=True)
    e = jnp.exp(z - m)
    gd = e / jnp.sum(e, axis=-1, keepdims=True)         # (B, S)

    # soft group loss / soft group count
    gloss = jnp.sum(gd * loss, axis=0, keepdims=True)   # (1, S)
    gcount = jnp.sum(gd, axis=0, keepdims=True)         # (1, S)

    # prediction = argmax(logits, 1) (first maximal index), correctness
    iota_c = jax.lax.broadcasted_iota(jnp.int32, (B, C), 1)
    max_l = jnp.max(logits, axis=1, keepdims=True)
    pred = jnp.min(jnp.where(logits == max_l, iota_c, C), axis=1, keepdims=True)
    correct = (pred.astype(jnp.float32) == labels).astype(jnp.float32)   # (B, 1)

    # hard group index = argmax(gd, 1) (first maximal index)
    iota_s = jax.lax.broadcasted_iota(jnp.int32, (B, S), 1)
    max_g = jnp.max(gd, axis=1, keepdims=True)
    gidx = jnp.min(jnp.where(gd == max_g, iota_s, S), axis=1, keepdims=True)
    onehot = (iota_s == gidx).astype(jnp.float32)                        # (B, S)

    cnt = jnp.sum(onehot, axis=0, keepdims=True)                         # (1, S)
    acc_sum = jnp.sum(onehot * correct, axis=0, keepdims=True)           # (1, S)
    gacc = acc_sum / (cnt + (cnt == 0).astype(jnp.float32))              # exact

    # dist.all_reduce(SUM) is identity on one device; normalized group loss
    group_losses = gloss / (gcount + (gcount == 0).astype(jnp.float32))

    # adversary regularizers fused in-kernel so gd is never re-read from HBM:
    #   reg1 mean = mean_b sum_s gd*log(gd)   (== -entropy, eps-clamped log)
    #   reg2      = KL(marginal || uniform)
    ent = jnp.sum(gd * jnp.log(jnp.maximum(gd, eps)), axis=1, keepdims=True)
    ent_mean = jnp.sum(ent, axis=0, keepdims=True) * (1.0 / B)           # (1, 1)
    marginal = gcount / jnp.sum(gcount, axis=1, keepdims=True)
    log_unif = math.log(1.0 / S)
    marg_kl = jnp.sum(marginal * (jnp.log(jnp.maximum(marginal, eps)) - log_unif),
                      axis=1, keepdims=True)                             # (1, 1)

    gd_ref[...] = gd
    stats = jnp.concatenate(
        [gloss, gcount, gacc, cnt, group_losses,
         jnp.broadcast_to(ent_mean, (1, S)),
         jnp.broadcast_to(marg_kl, (1, S)),
         jnp.zeros((1, S), jnp.float32)], axis=0)                        # (8, S)
    stats_ref[...] = stats                                               # one store


def domino_fused(x, logits, losses, labels, params):
    """Returns (gd, gloss, gcount, gacc, gacc_cnt, group_losses, ent_mean, marg_kl)."""
    B, _ = x.shape
    C = logits.shape[1]
    S = params["w3"].shape[1]

    # only the tiny tensors get packed; x stays its own VMEM input
    small = jnp.concatenate(
        [logits.astype(jnp.float32),
         losses.reshape(B, 1).astype(jnp.float32),
         labels.reshape(B, 1).astype(jnp.float32)], axis=1)       # (B, C+2)

    vmem = pl.BlockSpec(memory_space=pltpu.MemorySpace.VMEM)
    gd, stats = pl.pallas_call(
        functools.partial(_domino_fused_kernel, C, 1e-12),
        out_shape=(jax.ShapeDtypeStruct((B, S), jnp.float32),
                   jax.ShapeDtypeStruct((8, S), jnp.float32)),
        in_specs=[vmem] * 8,
        out_specs=(vmem, vmem),
    )(x.astype(jnp.float32), small,
      params["w1"], params["w2"], params["w3"],
      params["b1"].reshape(1, -1), params["b2"].reshape(1, -1),
      params["b3"].reshape(1, -1))

    return (gd, stats[0], stats[1], stats[2], stats[3], stats[4],
            stats[5, 0], stats[6, 0])


# ----------------------------------------------------------------------------
# Plain-JAX glue (runs under jit): greedy group-DRO weighting, EMA, stats
# ----------------------------------------------------------------------------
def _greedy_probs(ref_loss, count_cat, alpha, fill_value, adversary):
    S = ref_loss.shape[0]
    order = jnp.argsort(-ref_loss)                      # descending sort idx
    past_frac = count_cat / jnp.sum(count_cat)
    sorted_frac = past_frac[order]
    cum = jnp.cumsum(sorted_frac)
    cutoff = jnp.sum((cum < alpha).astype(jnp.int32))
    cutoff = jnp.where(cutoff == S, S - 1, cutoff)
    rank = jnp.arange(S)
    head_frac_sum = jnp.sum(jnp.where(rank < cutoff, sorted_frac, 0.0))
    cut_frac = sorted_frac[cutoff]
    # guard against /0 (torch reference is unguarded and would NaN here)
    safe_cut_frac = jnp.where(cut_frac == 0.0, 1.0, cut_frac)
    if adversary:
        head_val = 1.0 * alpha
        tiebreak = (1.0 - head_frac_sum * alpha) * cut_frac
    else:
        head_val = 1.0 / alpha
        tiebreak = (1.0 - head_frac_sum / alpha) / safe_cut_frac
    probs_sorted = jnp.where(rank < cutoff, head_val, fill_value)
    probs_sorted = jnp.where(rank == cutoff, tiebreak, probs_sorted)
    return jnp.zeros_like(ref_loss).at[order].set(probs_sorted)


def _update_stats(state, actual_loss, group_loss, group_acc, group_count,
                  weights, cfg):
    s = dict(state)
    denom = s["processed_data_counts"] + group_count
    denom = denom + (denom == 0).astype(jnp.float32)
    prev_w = s["processed_data_counts"] / denom
    curr_w = group_count / denom
    s["avg_group_loss"] = prev_w * s["avg_group_loss"] + curr_w * group_loss
    s["avg_group_acc"] = prev_w * s["avg_group_acc"] + curr_w * group_acc
    bdenom = s["batch_count"] + 1.0
    s["avg_actual_loss"] = (s["batch_count"] / bdenom * s["avg_actual_loss"]
                            + 1.0 / bdenom * actual_loss)
    s["processed_data_counts"] = s["processed_data_counts"] + group_count
    if cfg["is_robust"]:
        s["update_data_counts"] = (s["update_data_counts"]
                                   + group_count * (weights > 0).astype(jnp.float32))
        s["update_batch_counts"] = (s["update_batch_counts"]
                                    + (group_count * weights > 0).astype(jnp.float32))
    else:
        s["update_data_counts"] = s["update_data_counts"] + group_count
        s["update_batch_counts"] = (s["update_batch_counts"]
                                    + (group_count > 0).astype(jnp.float32))
    s["batch_count"] = s["batch_count"] + 1.0
    group_frac = s["processed_data_counts"] / jnp.sum(s["processed_data_counts"])
    s["avg_per_sample_loss"] = group_frac @ s["avg_group_loss"]
    s["avg_acc"] = group_frac @ s["avg_group_acc"]
    return s


def _domino_forward_impl(params, state, cfg, group_features, per_sample_losses,
                         logits, labels, adversary):
    # fused Pallas kernel: MLP + softmax + group reductions + regularizer terms
    (gd, _gloss, gcount, mb_acc, mb_cnt,
     group_losses, ent_mean, marg_kl) = domino_fused(
        group_features, logits, per_sample_losses, labels, params)

    exp_avg_loss = state["exp_avg_loss"]
    count_cat = state["count_cat"]
    exp_avg_init = state["exp_avg_initialized"]
    if not adversary:
        prev_w = ((1.0 - cfg["gamma"] * (gcount > 0).astype(jnp.float32))
                  * (exp_avg_init > 0).astype(jnp.float32))
        curr_w = 1.0 - prev_w
        exp_avg_loss = exp_avg_loss * prev_w + group_losses * curr_w
        # NOTE: the 0.05 decay is hard-coded in the reference torch module too.
        count_cat = count_cat * (1.0 - 0.05) + 0.05 * gcount
        exp_avg_init = ((exp_avg_init > 0) | (gcount > 0)).astype(jnp.int32)

    adjusted_loss = exp_avg_loss + state["adj"] / jnp.sqrt(count_cat)

    if adversary:
        weights = _greedy_probs(adjusted_loss, count_cat, cfg["alpha"],
                                cfg["max_var_weight"], adversary=True)
        loss = -(group_losses @ weights)
        loss = loss + cfg["entropy_reg"] * ent_mean      # -entropy mean (in-kernel)
        loss = loss + cfg["marginal_reg"] * marg_kl      # KL(marginal||uniform)
    else:
        weights = _greedy_probs(adjusted_loss, count_cat, cfg["alpha"],
                                cfg["min_var_weight"], adversary=False)
        loss = group_losses @ weights

    new_state = dict(state, exp_avg_loss=exp_avg_loss, count_cat=count_cat,
                     exp_avg_initialized=exp_avg_init, adv_probs=weights,
                     group_loss=group_losses, group_distribution=gd)
    new_state = _update_stats(new_state, loss, group_losses, mb_acc, mb_cnt,
                              weights, cfg)
    return loss, logits, new_state


def make_domino_forward(cfg):
    """cfg (python scalars) is baked in via closure; `adversary` is static."""
    @functools.partial(jax.jit, static_argnames=("adversary",))
    def fwd(params, state, group_features, per_sample_losses, logits, labels,
            adversary=False):
        return _domino_forward_impl(params, state, cfg, group_features,
                                    per_sample_losses, logits, labels,
                                    adversary)
    return fwd


# ----------------------------------------------------------------------------
# Deterministic parameter / state init (matches grouper_model shapes)
# ----------------------------------------------------------------------------
def init_params(key, n_features, n_slices):
    dims = [(n_features, 64), (64, 32), (32, n_slices)]
    params = {}
    for i, (fin, fout) in enumerate(dims, start=1):
        key, kw, kb = jax.random.split(key, 3)
        bound = 1.0 / jnp.sqrt(fin)
        params[f"w{i}"] = jax.random.uniform(kw, (fin, fout), jnp.float32,
                                             -bound, bound)
        params[f"b{i}"] = jax.random.uniform(kb, (fout,), jnp.float32,
                                             -bound, bound)
    return params


def init_state(n_slices, batch_size):
    z = jnp.zeros((n_slices,), jnp.float32)
    o = jnp.ones((n_slices,), jnp.float32)
    return dict(
        adj=z, adv_probs=o, group_loss=z, count_cat=o, exp_avg_loss=z,
        exp_avg_initialized=jnp.zeros((n_slices,), jnp.int32),
        group_distribution=jnp.full((batch_size, n_slices), 1.0 / n_slices),
        processed_data_counts=z, update_data_counts=z, update_batch_counts=z,
        avg_group_loss=z, avg_group_acc=z,
        avg_per_sample_loss=jnp.float32(0.0), avg_actual_loss=jnp.float32(0.0),
        avg_acc=jnp.float32(0.0), batch_count=jnp.float32(0.0))


if __name__ == "__main__":
    B, F, S, C = 8, 32, 8, 4     # batch, n_features, n_slices, num classes

    cfg = dict(n_slices=S, gamma=0.1, alpha=0.5, min_var_weight=0.0,
               max_var_weight=1.0, entropy_reg=0.01, marginal_reg=0.01,
               is_robust=True)

    key = jax.random.PRNGKey(0)
    kp, kx, kl, ky, kb = jax.random.split(key, 5)
    params = init_params(kp, F, S)
    state = init_state(S, B)

    group_features = jax.random.normal(kx, (B, F), jnp.float32)
    per_sample_losses = jax.random.uniform(kl, (B,), jnp.float32)   # task-model loss
    logits = jax.random.normal(ky, (B, C), jnp.float32)             # task-model logits
    labels = jax.random.randint(kb, (B,), 0, C, jnp.int32)

    fwd = make_domino_forward(cfg)
    loss, out_logits, new_state = fwd(params, state, group_features,
                                      per_sample_losses, logits, labels,
                                      adversary=False)
    adv_loss, _, _ = fwd(params, new_state, group_features, per_sample_losses,
                         logits, labels, adversary=True)

    jax.block_until_ready((loss, out_logits, adv_loss, new_state))
    print("KERNEL_OK")
</pallas_src>

<mosaic_0001>
module attributes {stable_mosaic.version = 11 : i64} {
  func.func @_domino_fused_kernel(%arg0: memref<8x32xf32, #tpu.memory_space<vmem>>, %arg1: memref<8x6xf32, #tpu.memory_space<vmem>>, %arg2: memref<32x64xf32, #tpu.memory_space<vmem>>, %arg3: memref<64x32xf32, #tpu.memory_space<vmem>>, %arg4: memref<32x8xf32, #tpu.memory_space<vmem>>, %arg5: memref<1x64xf32, #tpu.memory_space<vmem>>, %arg6: memref<1x32xf32, #tpu.memory_space<vmem>>, %arg7: memref<1x8xf32, #tpu.memory_space<vmem>>, %arg8: memref<8x8xf32, #tpu.memory_space<vmem>>, %arg9: memref<8x8xf32, #tpu.memory_space<vmem>>) attributes {dimension_semantics = [], scalar_prefetch = 0 : i64, scratch_operands = 0 : i64, tpu.core_type = #tpu.core_type<tc>} {
    %c0 = arith.constant 0 : index
    %c0_0 = arith.constant 0 : index
    %0 = vector.load %arg0[%c0, %c0_0] : memref<8x32xf32, #tpu.memory_space<vmem>>, vector<8x32xf32>
    %c0_1 = arith.constant 0 : index
    %c0_2 = arith.constant 0 : index
    %1 = vector.load %arg1[%c0_1, %c0_2] : memref<8x6xf32, #tpu.memory_space<vmem>>, vector<8x6xf32>
    %2 = vector.extract_strided_slice %1 {offsets = [0, 0], sizes = [8, 4], strides = [1, 1]} : vector<8x6xf32> to vector<8x4xf32>
    %3 = vector.extract_strided_slice %1 {offsets = [0, 4], sizes = [8, 1], strides = [1, 1]} : vector<8x6xf32> to vector<8x1xf32>
    %4 = vector.extract_strided_slice %1 {offsets = [0, 5], sizes = [8, 1], strides = [1, 1]} : vector<8x6xf32> to vector<8x1xf32>
    %5 = arith.truncf %0 : vector<8x32xf32> to vector<8x32xbf16>
    %c0_3 = arith.constant 0 : index
    %c0_4 = arith.constant 0 : index
    %6 = vector.load %arg2[%c0_3, %c0_4] : memref<32x64xf32, #tpu.memory_space<vmem>>, vector<32x64xf32>
    %7 = arith.truncf %6 : vector<32x64xf32> to vector<32x64xbf16>
    %cst = arith.constant dense<0.000000e+00> : vector<8x64xf32>
    %8 = tpu.matmul %5, %7, %cst {dimension_numbers = #tpu.dot_dimension_numbers<[1], [0], [0], [1], [0, 0, 1, 1], [], []>} : vector<8x32xbf16>, vector<32x64xbf16>, vector<8x64xf32> -> vector<8x64xf32>
    %c0_5 = arith.constant 0 : index
    %c0_6 = arith.constant 0 : index
    %9 = vector.load %arg5[%c0_5, %c0_6] : memref<1x64xf32, #tpu.memory_space<vmem>>, vector<1x64xf32>
    %10 = vector.broadcast %9 : vector<1x64xf32> to vector<8x64xf32>
    %11 = arith.addf %8, %10 : vector<8x64xf32>
    %cst_7 = arith.constant 0.000000e+00 : f32
    %12 = vector.broadcast %cst_7 : f32 to vector<8x64xf32>
    %13 = arith.maximumf %11, %12 : vector<8x64xf32>
    %14 = arith.truncf %13 : vector<8x64xf32> to vector<8x64xbf16>
    %c0_8 = arith.constant 0 : index
    %c0_9 = arith.constant 0 : index
    %15 = vector.load %arg3[%c0_8, %c0_9] : memref<64x32xf32, #tpu.memory_space<vmem>>, vector<64x32xf32>
    %16 = arith.truncf %15 : vector<64x32xf32> to vector<64x32xbf16>
    %cst_10 = arith.constant dense<0.000000e+00> : vector<8x32xf32>
    %17 = tpu.matmul %14, %16, %cst_10 {dimension_numbers = #tpu.dot_dimension_numbers<[1], [0], [0], [1], [0, 0, 1, 1], [], []>} : vector<8x64xbf16>, vector<64x32xbf16>, vector<8x32xf32> -> vector<8x32xf32>
    %c0_11 = arith.constant 0 : index
    %c0_12 = arith.constant 0 : index
    %18 = vector.load %arg6[%c0_11, %c0_12] : memref<1x32xf32, #tpu.memory_space<vmem>>, vector<1x32xf32>
    %19 = vector.broadcast %18 : vector<1x32xf32> to vector<8x32xf32>
    %20 = arith.addf %17, %19 : vector<8x32xf32>
    %cst_13 = arith.constant 0.000000e+00 : f32
    %21 = vector.broadcast %cst_13 : f32 to vector<8x32xf32>
    %22 = arith.maximumf %20, %21 : vector<8x32xf32>
    %23 = arith.truncf %22 : vector<8x32xf32> to vector<8x32xbf16>
    %c0_14 = arith.constant 0 : index
    %c0_15 = arith.constant 0 : index
    %24 = vector.load %arg4[%c0_14, %c0_15] : memref<32x8xf32, #tpu.memory_space<vmem>>, vector<32x8xf32>
    %25 = arith.truncf %24 : vector<32x8xf32> to vector<32x8xbf16>
    %cst_16 = arith.constant dense<0.000000e+00> : vector<8x8xf32>
    %26 = tpu.matmul %23, %25, %cst_16 {dimension_numbers = #tpu.dot_dimension_numbers<[1], [0], [0], [1], [0, 0, 1, 1], [], []>} : vector<8x32xbf16>, vector<32x8xbf16>, vector<8x8xf32> -> vector<8x8xf32>
    %c0_17 = arith.constant 0 : index
    %c0_18 = arith.constant 0 : index
    %27 = vector.load %arg7[%c0_17, %c0_18] : memref<1x8xf32, #tpu.memory_space<vmem>>, vector<1x8xf32>
    %28 = vector.broadcast %27 : vector<1x8xf32> to vector<8x8xf32>
    %29 = arith.addf %26, %28 : vector<8x8xf32>
    %cst_19 = arith.constant dense<0xFF800000> : vector<8xf32>
    %30 = vector.multi_reduction <maximumf>, %29, %cst_19 [1] : vector<8x8xf32> to vector<8xf32>
    %31 = vector.shape_cast %30 : vector<8xf32> to vector<8x1xf32>
    %32 = vector.broadcast %31 : vector<8x1xf32> to vector<8x8xf32>
    %33 = arith.subf %29, %32 : vector<8x8xf32>
    %34 = math.exp %33 : vector<8x8xf32>
    %cst_20 = arith.constant dense<0.000000e+00> : vector<8xf32>
    %35 = vector.multi_reduction <add>, %34, %cst_20 [1] : vector<8x8xf32> to vector<8xf32>
    %36 = vector.shape_cast %35 : vector<8xf32> to vector<8x1xf32>
    %37 = vector.broadcast %36 : vector<8x1xf32> to vector<8x8xf32>
    %38 = arith.divf %34, %37 : vector<8x8xf32>
    %39 = vector.broadcast %3 : vector<8x1xf32> to vector<8x8xf32>
    %40 = arith.mulf %38, %39 : vector<8x8xf32>
    %cst_21 = arith.constant dense<0.000000e+00> : vector<8xf32>
    %41 = vector.multi_reduction <add>, %40, %cst_21 [0] : vector<8x8xf32> to vector<8xf32>
    %42 = vector.shape_cast %41 : vector<8xf32> to vector<1x8xf32>
    %cst_22 = arith.constant dense<0.000000e+00> : vector<8xf32>
    %43 = vector.multi_reduction <add>, %38, %cst_22 [0] : vector<8x8xf32> to vector<8xf32>
    %44 = vector.shape_cast %43 : vector<8xf32> to vector<1x8xf32>
    %45 = tpu.iota {dimensions = array<i32: 1>} : vector<8x4xi32>
    %cst_23 = arith.constant dense<0xFF800000> : vector<8xf32>
    %46 = vector.multi_reduction <maximumf>, %2, %cst_23 [1] : vector<8x4xf32> to vector<8xf32>
    %47 = vector.shape_cast %46 : vector<8xf32> to vector<8x1xf32>
    %48 = vector.broadcast %47 : vector<8x1xf32> to vector<8x4xf32>
    %49 = arith.cmpf oeq, %2, %48 : vector<8x4xf32>
    %c4_i32 = arith.constant 4 : i32
    %50 = vector.broadcast %c4_i32 : i32 to vector<8x4xi32>
    %51 = arith.select %49, %45, %50 : vector<8x4xi1>, vector<8x4xi32>
    %cst_24 = arith.constant dense<2147483647> : vector<8xi32>
    %52 = vector.multi_reduction <minsi>, %51, %cst_24 [1] : vector<8x4xi32> to vector<8xi32>
    %53 = vector.shape_cast %52 : vector<8xi32> to vector<8x1xi32>
    %54 = arith.sitofp %53 : vector<8x1xi32> to vector<8x1xf32>
    %55 = arith.cmpf oeq, %54, %4 : vector<8x1xf32>
    %56 = arith.extui %55 : vector<8x1xi1> to vector<8x1xi32>
    %57 = arith.sitofp %56 : vector<8x1xi32> to vector<8x1xf32>
    %58 = tpu.iota {dimensions = array<i32: 1>} : vector<8x8xi32>
    %cst_25 = arith.constant dense<0xFF800000> : vector<8xf32>
    %59 = vector.multi_reduction <maximumf>, %38, %cst_25 [1] : vector<8x8xf32> to vector<8xf32>
    %60 = vector.shape_cast %59 : vector<8xf32> to vector<8x1xf32>
    %61 = vector.broadcast %60 : vector<8x1xf32> to vector<8x8xf32>
    %62 = arith.cmpf oeq, %38, %61 : vector<8x8xf32>
    %c8_i32 = arith.constant 8 : i32
    %63 = vector.broadcast %c8_i32 : i32 to vector<8x8xi32>
    %64 = arith.select %62, %58, %63 : vector<8x8xi1>, vector<8x8xi32>
    %cst_26 = arith.constant dense<2147483647> : vector<8xi32>
    %65 = vector.multi_reduction <minsi>, %64, %cst_26 [1] : vector<8x8xi32> to vector<8xi32>
    %66 = vector.shape_cast %65 : vector<8xi32> to vector<8x1xi32>
    %67 = vector.broadcast %66 : vector<8x1xi32> to vector<8x8xi32>
    %68 = arith.cmpi eq, %58, %67 : vector<8x8xi32>
    %69 = arith.extui %68 : vector<8x8xi1> to vector<8x8xi32>
    %70 = arith.sitofp %69 : vector<8x8xi32> to vector<8x8xf32>
    %cst_27 = arith.constant dense<0.000000e+00> : vector<8xf32>
    %71 = vector.multi_reduction <add>, %70, %cst_27 [0] : vector<8x8xf32> to vector<8xf32>
    %72 = vector.shape_cast %71 : vector<8xf32> to vector<1x8xf32>
    %73 = vector.broadcast %57 : vector<8x1xf32> to vector<8x8xf32>
    %74 = arith.mulf %70, %73 : vector<8x8xf32>
    %cst_28 = arith.constant dense<0.000000e+00> : vector<8xf32>
    %75 = vector.multi_reduction <add>, %74, %cst_28 [0] : vector<8x8xf32> to vector<8xf32>
    %76 = vector.shape_cast %75 : vector<8xf32> to vector<1x8xf32>
    %cst_29 = arith.constant 0.000000e+00 : f32
    %77 = vector.broadcast %cst_29 : f32 to vector<1x8xf32>
    %78 = arith.cmpf oeq, %72, %77 : vector<1x8xf32>
    %79 = arith.extui %78 : vector<1x8xi1> to vector<1x8xi32>
    %80 = arith.sitofp %79 : vector<1x8xi32> to vector<1x8xf32>
    %81 = arith.addf %72, %80 : vector<1x8xf32>
    %82 = arith.divf %76, %81 : vector<1x8xf32>
    %cst_30 = arith.constant 0.000000e+00 : f32
    %83 = vector.broadcast %cst_30 : f32 to vector<1x8xf32>
    %84 = arith.cmpf oeq, %44, %83 : vector<1x8xf32>
    %85 = arith.extui %84 : vector<1x8xi1> to vector<1x8xi32>
    %86 = arith.sitofp %85 : vector<1x8xi32> to vector<1x8xf32>
    %87 = arith.addf %44, %86 : vector<1x8xf32>
    %88 = arith.divf %42, %87 : vector<1x8xf32>
    %cst_31 = arith.constant 9.99999996E-13 : f32
    %89 = vector.broadcast %cst_31 : f32 to vector<8x8xf32>
    %90 = arith.maximumf %38, %89 : vector<8x8xf32>
    %91 = math.log %90 : vector<8x8xf32>
    %92 = arith.mulf %38, %91 : vector<8x8xf32>
    %cst_32 = arith.constant dense<0.000000e+00> : vector<8xf32>
    %93 = vector.multi_reduction <add>, %92, %cst_32 [1] : vector<8x8xf32> to vector<8xf32>
    %94 = vector.shape_cast %93 : vector<8xf32> to vector<8x1xf32>
    %cst_33 = arith.constant dense<0.000000e+00> : vector<1xf32>
    %95 = vector.multi_reduction <add>, %94, %cst_33 [0] : vector<8x1xf32> to vector<1xf32>
    %96 = vector.shape_cast %95 : vector<1xf32> to vector<1x1xf32>
    %cst_34 = arith.constant 1.250000e-01 : f32
    %97 = vector.broadcast %cst_34 : f32 to vector<1x1xf32>
    %98 = arith.mulf %96, %97 : vector<1x1xf32>
    %cst_35 = arith.constant dense<0.000000e+00> : vector<1xf32>
    %99 = vector.multi_reduction <add>, %44, %cst_35 [1] : vector<1x8xf32> to vector<1xf32>
    %100 = vector.shape_cast %99 : vector<1xf32> to vector<1x1xf32>
    %101 = vector.broadcast %100 : vector<1x1xf32> to vector<1x8xf32>
    %102 = arith.divf %44, %101 : vector<1x8xf32>
    %cst_36 = arith.constant 9.99999996E-13 : f32
    %103 = vector.broadcast %cst_36 : f32 to vector<1x8xf32>
    %104 = arith.maximumf %102, %103 : vector<1x8xf32>
    %105 = math.log %104 : vector<1x8xf32>
    %cst_37 = arith.constant -2.07944155 : f32
    %106 = vector.broadcast %cst_37 : f32 to vector<1x8xf32>
    %107 = arith.subf %105, %106 : vector<1x8xf32>
    %108 = arith.mulf %102, %107 : vector<1x8xf32>
    %cst_38 = arith.constant dense<0.000000e+00> : vector<1xf32>
    %109 = vector.multi_reduction <add>, %108, %cst_38 [1] : vector<1x8xf32> to vector<1xf32>
    %110 = vector.shape_cast %109 : vector<1xf32> to vector<1x1xf32>
    %c0_39 = arith.constant 0 : index
    %c0_40 = arith.constant 0 : index
    %111 = vector.load %arg8[%c0_39, %c0_40] : memref<8x8xf32, #tpu.memory_space<vmem>>, vector<8x8xf32>
    tpu.vector_store %arg8[%c0_39, %c0_40], %38 {strides = array<i32>} : memref<8x8xf32, #tpu.memory_space<vmem>>, vector<8x8xf32>,
    %112 = vector.shape_cast %98 : vector<1x1xf32> to vector<1x1xf32>
    %113 = vector.broadcast %112 : vector<1x1xf32> to vector<1x8xf32>
    %114 = vector.shape_cast %110 : vector<1x1xf32> to vector<1x1xf32>
    %115 = vector.broadcast %114 : vector<1x1xf32> to vector<1x8xf32>
    %cst_41 = arith.constant 0.000000e+00 : f32
    %116 = vector.broadcast %cst_41 : f32 to vector<1x8xf32>
    %117 = tpu.concatenate %42, %44, %82, %72, %88, %113, %115, %116 in 0 : vector<1x8xf32>, vector<1x8xf32>, vector<1x8xf32>, vector<1x8xf32>, vector<1x8xf32>, vector<1x8xf32>, vector<1x8xf32>, vector<1x8xf32> -> vector<8x8xf32>
    %c0_42 = arith.constant 0 : index
    %c0_43 = arith.constant 0 : index
    %118 = vector.load %arg9[%c0_42, %c0_43] : memref<8x8xf32, #tpu.memory_space<vmem>>, vector<8x8xf32>
    tpu.vector_store %arg9[%c0_42, %c0_43], %117 {strides = array<i32>} : memref<8x8xf32, #tpu.memory_space<vmem>>, vector<8x8xf32>,
    return
  }
}

</mosaic_0001>

<bundles_post_ra>
// kernel: fwd.1
= control target key start
LH: loop header
LB: loop body
LE: loop exit
PB: predicated region body
PF: predicated region fallthrough
CT: control target
= control target key end

     0   :  { %v486_v3 = vmov 0.0   ;;  %vm487_vm0 = vmmov 0   ;;  %s681_s0 = inlined_call_operand.vmem [shape: f32[8,32], index: 0, kind: input, shape index: {}]   ;;  %s682_s1 = inlined_call_operand.vmem [shape: f32[8,6], index: 1, kind: input, shape index: {}]   ;;  %s683_s2 = inlined_call_operand.vmem [shape: f32[32,64], index: 2, kind: input, shape index: {}]   ;;  %s684_s3 = inlined_call_operand.vmem [shape: f32[64,32], index: 3, kind: input, shape index: {}]   ;;  %s685_s4 = inlined_call_operand.vmem [shape: f32[32,8], index: 4, kind: input, shape index: {}]   ;;  %s686_s5 = inlined_call_operand.vmem [shape: f32[1,64], index: 5, kind: input, shape index: {}]   ;;  %s687_s6 = inlined_call_operand.vmem [shape: f32[1,32], index: 6, kind: input, shape index: {}]   ;;  %s688_s7 = inlined_call_operand.vmem [shape: f32[1,8], index: 7, kind: input, shape index: {}]   ;;  %s689_s8 = inlined_call_operand.hbm [shape: f32[8,8], index: 8, kind: output, shape index: {0}]   ;;  %s690_s9 = inlined_call_operand.vmem [shape: f32[8,8], index: 9, kind: output, shape index: {1}]  }
   0x1   :  { %v36_v0 = vld [vmem:[%s683_s2] sm:$0xff]  ;;  %v37_v1 = vld [vmem:[%s683_s2 + $0x8] sm:$0xff]  ;;  %v38_v2 = vld [vmem:[%s683_s2 + $0x10] sm:$0xff]  ;;  %413 = vmatprep.subr.bf16.mxu0 %v486_v3  ;;  %417 = vmatprep.mubr.msk.bf16.mxu0 %vm487_vm0, %v486_v3 }
   0x2   :  { %v40_v4 = vpack.c.bf16 %v37_v1, %v36_v0  ;;  %v39_v5 = vld [vmem:[%s683_s2 + $0x18] sm:$0xff]  ;;  %v95_v6 = vld [vmem:[%s684_s3] sm:$0xff]  ;;  %421 = vmatprep.subr.bf16.mxu1 %v486_v3  ;;  %v96_v7 = vld [vmem:[%s684_s3 + $0x8] sm:$0xff]  ;;  %429 = vmatprep.mubr.msk.bf16.mxu1 %vm487_vm0, %v486_v3 }
   0x3   :  { %v97_v8 = vld [vmem:[%s684_s3 + $0x10] sm:$0xff]  ;;  %v98_v9 = vld [vmem:[%s684_s3 + $0x18] sm:$0xff]  ;;  %v41_v10 = vpack.c.bf16 %v39_v5, %v38_v2  ;;  %v33_v11 = vld [vmem:[%s681_s0] sm:$0xff]  ;;  %v103_v12 = vpack.c.bf16 %v96_v7, %v95_v6 }
   0x4   :  { %414 = vmatpush3.bf16.msra.mxu0 %v40_v4 }
   0x5   :  { %15 = vsyncpa [#allocation3], 0  ;;  %415 = vmatprep.subr.bf16.mxu0 %v486_v3  ;;  %422 = vmatpush3.bf16.msra.mxu1 %v103_v12  ;;  %v104_v13 = vpack.c.bf16 %v98_v9, %v97_v8  ;;  %v35_v14 = vpack.c.bf16 %v33_v11, %v33_v11  ;;  %vm49_vm1 = vcmask 261120   ;;  %v99_v15 = vld [vmem:[%s684_s3 + $0x20] sm:$0xff]  ;;  %v100_v16 = vld [vmem:[%s684_s3 + $0x28] sm:$0xff]  ;;  %vm114_vm2 = vcmask 523264  }
   0x6   :  { %423 = vmatprep.subr.bf16.mxu1 %v486_v3  ;;  %v105_v17 = vpack.c.bf16 %v100_v16, %v99_v15  ;;  %v101_v18 = vld [vmem:[%s684_s3 + $0x30] sm:$0xff]  ;;  %v102_v19 = vld [vmem:[%s684_s3 + $0x38] sm:$0xff]  ;;  %v160_v21 = vld [vmem:[%s685_s4] sm:$0xff]  ;;  %vm250_vm3 = vcmask 31744   ;;  %vm216_vm4 = vcmask 64512   ;;  %v248_v52 = vlaneseq }
   0x7   :  { %v106_v20 = vpack.c.bf16 %v102_v19, %v101_v18  ;;  %v161_v22 = vld [vmem:[%s685_s4 + $0x8] sm:$0xff]  ;;  %v391_v24 = vld [vmem:[%s686_s5] ss:$0 sm:$0xff]  ;;  %v162_v32 = vld [vmem:[%s685_s4 + $0x10] sm:$0xff] }
   0x8   :  { %416 = vmatpush3.bf16.msra.mxu0 %v41_v10  ;;  %v164_v23 = vpack.c.bf16 %v161_v22, %v160_v21  ;;  %v163_v33 = vld [vmem:[%s685_s4 + $0x18] sm:$0xff]  ;;  %v393_v35 = vld [vmem:[%s687_s6] ss:$0 sm:$0xff]  ;;  %v625_v57 = vand.u32 127, %v248_v52 }
   0x9   :  { %433 = vmatprep.subr.bf16.mxu0 %v486_v3  ;;  %424 = vmatpush3.bf16.msra.mxu1 %v104_v13  ;;  %v165_v34 = vpack.c.bf16 %v163_v33, %v162_v32  ;;  %v617_v43 = vld [vmem:[%s682_s1] sm:$0xff]  ;;  %v488_v13 = vmov 4   ;;  %v489_v32 = vmov 5   ;;  %s490_s1 = smov [#allocation2]  }
   0xa   :  { %425 = vmatprep.subr.bf16.mxu1 %v486_v3  ;;  %v251_v44 = vsel %vm250_vm3, %v617_v43, -inf  ;;  %v395_v45 = vld [vmem:[%s688_s7] ss:$0 sm:$0xff]  ;;  %447 = vset.pattern.permute.xlu1 %v488_v13  ;;  %s379_s7 = sshll.u32 %s490_s1, 4  ;;  %s380_s7 = int_to_ptr.vmem [resolvable:$true] %s379_s7 }
   0xb   :  { %418 = vmatmul.mubr.msk.bf16.vlgmr.msra.gmra.mrb[0].mxu0 %vm49_vm1, %v35_v14  ;;  %252 = vmax.xlane.f32.xlu1 %v251_v44  ;;  %s462_s2 = scalar_lea.vmem %s380_s7, 128  ;;  %p467_p1 = scmp.lt.s32.totalorder %s380_s7, %s380_s7 }
   0xc   :  { %437 = vmatprep.mubr.msk.bf16.mxu0 %vm487_vm0, %v486_v3  ;;  %434 = vmatpush3.bf16.msra.mxu0 %v164_v23  ;;  %p463_p0 = scmp.ne.s32.totalorder %s380_s7, %s462_s2  ;;  %p468_p2 = scmp.lt.s32.totalorder %s462_s2, %s462_s2 }
   0xd   :  { %426 = vmatpush3.bf16.msra.mxu1 %v105_v17  ;;  %435 = vmatprep.subr.bf16.mxu0 %v486_v3 }
   0xe   :  { %427 = vmatprep.subr.bf16.mxu1 %v486_v3  ;;  %446 = vset.pattern.permute.xlu0 %v489_v32  ;;  %p469_p3 = por %p468_p2, %p467_p1 }
  0x10   :  { %436 = vmatpush3.bf16.msra.mxu0 %v165_v34  ;;  %p470_p4 = pnand %p469_p3, %p463_p0 }
  0x11   :  { %428 = vmatpush3.bf16.msra.mxu1 %v106_v20 }
  0x98   :  { %v253_v55 = vpop.xlane.xlu1 %252 }
  0x99   :  { %vm254_vm5 = vcmp.eq.f32.partialorder %v617_v43, %v253_v55 }
  0x9a   :  { %v255_v58 = vsel %vm254_vm5, %v625_v57, 4 }
  0x9b   :  { %v256_v59 = vsel %vm250_vm3, %v255_v58, 2147483647 }
  0x9c   :  { %v258_v60 = vshra.s32 %v256_v59, 16  ;;  %v257_v18 = vand.u32 65535, %v256_v59 }
  0x9e   :  { %v260_v63 = vcvt.s32.f32 %v258_v60  ;;  %v259_v23 = vcvt.s32.f32 %v257_v18 }
  0xde   :  { %v87_v25 = vpop.f32.mrb[0].mxu0 }
  0xdf   :  { %v88_v26 = vadd.f32 %v391_v24, %v87_v25  ;;  %v419_v27 = vpop.f32.mrb[1].mxu0 }
  0xe0   :  { %v90_v28 = vpop.f32.mrb[2].mxu0 }
  0xe1   :  { %v93_v29 = vmax.f32 %v88_v26, 0.0  ;;  %v420_v30 = vpop.f32.mrb[3].mxu0 }
  0xe3   :  { %v94_v31 = vpack.c.bf16 %v93_v29, %v93_v29 }
  0xe5   :  { %430 = vmatmul.mubr.msk.bf16.vlgmr.msra.gmra.mrb[0].mxu1 %vm114_vm2, %v94_v31 }
 0x1b8   :  { %v152_v36 = vpop.f32.mrb[0].mxu1 }
 0x1b9   :  { %v153_v37 = vadd.f32 %v393_v35, %v152_v36  ;;  %v431_v38 = vpop.f32.mrb[1].mxu1 }
 0x1ba   :  { %v155_v39 = vpop.f32.mrb[2].mxu1 }
 0x1bb   :  { %v158_v40 = vmax.f32 %v153_v37, 0.0  ;;  %v432_v41 = vpop.f32.mrb[3].mxu1 }
 0x1bd   :  { %v159_v42 = vpack.c.bf16 %v158_v40, %v158_v40 }
 0x1bf   :  { %438 = vmatmul.mubr.msk.bf16.vlgmr.msra.gmra.mrb[4].mxu0 %vm49_vm1, %v159_v42 }
 0x292   :  { %v210_v46 = vpop.f32.mrb[4].mxu0 }
 0x293   :  { %v211_v47 = vadd.f32 %v395_v45, %v210_v46  ;;  %v439_v48 = vpop.f32.mrb[5].mxu0 }
 0x294   :  { %v213_v49 = vpop.f32.mrb[6].mxu0 }
 0x295   :  { %v440_v50 = vpop.f32.mrb[7].mxu0  ;;  %v217_v51 = vsel %vm216_vm4, %v211_v47, -inf }
 0x296   :  { %218 = vmax.xlane.f32.xlu0 %v217_v51 }
 0x323   :  { %v219_v53 = vpop.xlane.xlu0 %218 }
 0x324   :  { %v220_v54 = vsub.f32 %v211_v47, %v219_v53 }
 0x326   :  { %v221_v56 = vmul.f32 1.442695, %v220_v54 }
 0x328   :  { %448 = vpow2.f32 %v221_v56 }
 0x332   :  { %v449_v61 = vpop.eup %448 }
 0x333   :  { %v223_v62 = vsel %vm216_vm4, %v449_v61, 0.0 }
 0x334   :  { %224 = vadd.xlane.f32.xlu0 %v223_v62 }
 0x338   :  { %261 = vmin.xlane.f32.xlu0 %v260_v63 }
 0x3c1   :  { %v225_v0 = vpop.xlane.xlu0 %224 }
 0x3c2   :  { %450 = vrcp.f32 %v225_v0 }
 0x3c5   :  { %v262_v21 = vpop.xlane.xlu0 %261 }
 0x3c6   :  { %vm263_vm7 = vcmp.eq.f32.partialorder %v260_v63, %v262_v21  ;;  %v268_v44 = vcvt.f32.s32 %v262_v21 }
 0x3c7   :  { %v264_v25 = vsel %vm263_vm7, %v259_v23, inf }
 0x3c8   :  { %v269_v46 = vshll.u32 %v268_v44, 16 }
 0x3cc   :  { %v451_v1 = vpop.eup %450 }
 0x3cd   :  { %v631_v2 = vmul.f32 %v451_v1, %v449_v61 }
 0x3cf   :  { %357 = vst.msk [vmem:[#allocation2] sm:$0xff] %vm216_vm4, %v631_v2  ;;  %v275_v4 = vsel %vm216_vm4, %v631_v2, -inf  ;;  %v241_v5 = vsel %vm216_vm4, %v631_v2, 0.0  ;;  %v330_v14 = vmax.f32 %v631_v2, 1e-12 }
 0x3d0   :  { %276 = vmax.xlane.f32.xlu1 %v275_v4  ;;  %v242_v6 = vrot.slane %v241_v5, 4 }
 0x3d1   :  { %452 = vlog2.f32 %v330_v14 }
 0x3d2   :  { %v243_v7 = vadd.f32 %v242_v6, %v241_v5 }
 0x3d4   :  { %v244_v8 = vrot.slane %v243_v7, 2 }
 0x3d6   :  { %v245_v9 = vadd.f32 %v244_v8, %v243_v7 }
 0x3d8   :  { %v246_v10 = vrot.slane %v245_v9, 1 }
 0x3da   :  { %v639_v11 = vadd.f32 %v246_v10, %v245_v9 }
 0x3db   :  { %v453_v19 = vpop.eup %452 }
 0x3dc   :  { %v344_v12 = vsel %vm216_vm4, %v639_v11, 0.0  ;;  %v332_v24 = vmul.f32 0.6931472, %v453_v19 }
 0x3dd   :  { %345 = vadd.xlane.f32.xlu0 %v344_v12 }
 0x3de   :  { %v333_v26 = vmul.f32 %v332_v24, %v631_v2 }
 0x3e0   :  { %v334_v27 = vsel %vm216_vm4, %v333_v26, 0.0 }
 0x45d   :  { %v277_v15 = vpop.xlane.xlu1 %276 }
 0x45e   :  { %vm278_vm6 = vcmp.eq.f32.partialorder %v631_v2, %v277_v15 }
 0x45f   :  { %v279_v16 = vsel %vm278_vm6, %v625_v57, 8 }
 0x460   :  { %v280_v17 = vsel %vm216_vm4, %v279_v16, 2147483647 }
 0x461   :  { %v282_v20 = vshra.s32 %v280_v17, 16  ;;  %v281_v38 = vand.u32 65535, %v280_v17 }
 0x463   :  { %v284_v22 = vcvt.s32.f32 %v282_v20  ;;  %v283_v40 = vcvt.s32.f32 %v281_v38 }
 0x465   :  { %285 = vmin.xlane.f32.xlu1 %v284_v22 }
 0x469   :  { %265 = vmin.xlane.f32.xlu1 %v264_v25 }
 0x46a   :  { %v346_v28 = vpop.xlane.xlu0 %345 }
 0x46b   :  { %454 = vrcp.f32 %v346_v28 }
 0x46d   :  { %335 = vadd.xlane.f32.xlu1 %v334_v27 }
 0x475   :  { %v455_v29 = vpop.eup %454 }
 0x476   :  { %v348_v30 = vmul.f32 %v455_v29, %v639_v11 }
 0x478   :  { %v349_v31 = vmax.f32 %v348_v30, 1e-12 }
 0x47a   :  { %456 = vlog2.f32 %v349_v31 }
 0x47e   :  { %230 = vperm.xlu1 %447, %v617_v43  }
 0x484   :  { %v457_v33 = vpop.eup %456 }
 0x485   :  { %v351_v34 = vmul.f32 0.6931472, %v457_v33 }
 0x487   :  { %v401_v35 = vadd.f32 2.0794415, %v351_v34 }
 0x489   :  { %v353_v36 = vmul.f32 %v401_v35, %v348_v30 }
 0x48b   :  { %v354_v37 = vsel %vm216_vm4, %v353_v36, 0.0 }
 0x4a2   :  { %355 = vadd.xlane.f32.xlu1 %v354_v37 }
 0x4f2   :  { %v286_v39 = vpop.xlane.xlu1 %285 }
 0x4f3   :  { %vm287_vm8 = vcmp.eq.f32.partialorder %v284_v22, %v286_v39 }
 0x4f4   :  { %v288_v41 = vsel %vm287_vm8, %v283_v40, inf }
 0x4f5   :  { %289 = vmin.xlane.f32.xlu0 %v288_v41 }
 0x4f6   :  { %v266_v42 = vpop.xlane.xlu1 %265 }
 0x4f7   :  { %v267_v45 = vcvt.f32.s32 %v266_v42 }
 0x4f9   :  { %v270_v47 = vadd.s32 %v269_v46, %v267_v45 }
 0x4fb   :  { %v271_v48 = vcvt.s32.f32 %v270_v47 }
 0x4fd   :  { %vm272_vm9 = vcmp.eq.f32.partialorder %v271_v48, %v617_v43 }
 0x4fe   :  { %v397_v49 = vsel %vm272_vm9, 1.0, %v486_v3 }
 0x50b   :  { %307 = vperm.xlu0 %446, %v397_v49  }
 0x50c   :  { %473 = shalt.err (!%p470_p4)
}
 0x50d   :  { %s474_s0 = scalar_lea.hbm %s689_s8, 128 }
 0x50e   :  { %p475_p5 = scmp.ne.s32.totalorder %s689_s8, %s474_s0  ;;  %p478_p6 = scmp.lt.u32.totalorder %s474_s0, %s689_s8 }
 0x510   :  { %p480_p7 = pnand %p478_p6, %p475_p5 }
 0x512   :  { %483 = shalt.err (!%p480_p7)
}
 0x513   :  { %382 = dma.vmem_to_hbm [thread:$0]  %s380_s7, 128, %s689_s8, [#allocation3]   ;;  %v336_v43 = vpop.xlane.xlu1 %335  ;;  %v292_v50 = vcvt.f32.s32 %v286_v39  ;;  %vm324_vm11 = vcmp.eq.f32.partialorder %v639_v11, 0.0  ;;  %vm358_vm13 = vcmask 1040384   ;;  %vm360_vm14 = vcmask 1041408  }
 0x514   :  { %v337_v7 = vrot.slane %v336_v43, 4  ;;  %v400_v13 = vsel %vm324_vm11, 1.0, %v486_v3  ;;  %vm362_vm15 = vcmask 1042432   ;;  %vm364_vm0 = vcmask 1043456  }
 0x515   :  { %v293_v52 = vshll.u32 %v292_v50, 16  ;;  %v327_v18 = vadd.f32 %v400_v13, %v639_v11  ;;  %vm366_vm1 = vcmask 1044480   ;;  %vm368_vm2 = vcmask 1045504  }
 0x516   :  { %v338_v10 = vadd.f32 %v337_v7, %v336_v43  ;;  %vm370_vm3 = vcmask 1046528  }
 0x517   :  { %v231_v54 = vpop.permute.xlu1 %230 }
 0x518   :  { %v233_v56 = vmul.f32 %v231_v54, %v631_v2  ;;  %v339_v17 = vrot.slane %v338_v10, 2 }
 0x51a   :  { %v234_v62 = vsel %vm216_vm4, %v233_v56, 0.0  ;;  %v340_v22 = vadd.f32 %v339_v17, %v338_v10 }
 0x51b   :  { %v235_v4 = vrot.slane %v234_v62, 4 }
 0x51c   :  { %v341_v25 = vrot.slane %v340_v22, 1 }
 0x51e   :  { %v342_v29 = vadd.f32 %v341_v25, %v340_v22 }
 0x520   :  { %v343_v34 = vmul.f32 0.125, %v342_v29 }
 0x52f   :  { %v356_v37 = vpop.xlane.xlu1 %355 }
 0x582   :  { %v290_v51 = vpop.xlane.xlu0 %289 }
 0x583   :  { %v291_v53 = vcvt.f32.s32 %v290_v51 }
 0x585   :  { %v294_v55 = vadd.s32 %v293_v52, %v291_v53 }
 0x587   :  { %vm295_vm10 = vcmp.eq.s32.totalorder %v625_v57, %v294_v55  ;;  %v236_v57 = vadd.f32 %v235_v4, %v234_v62 }
 0x588   :  { %v398_v58 = vsel %vm295_vm10, 1.0, %v486_v3 }
 0x589   :  { %v298_v59 = vsel %vm216_vm4, %v398_v58, 0.0  ;;  %v237_v14 = vrot.slane %v236_v57, 2 }
 0x58a   :  { %v299_v60 = vrot.slane %v298_v59, 4  ;;  %v308_v61 = vpop.permute.xlu0 %307 }
 0x58b   :  { %v310_v63 = vmul.f32 %v398_v58, %v308_v61  ;;  %v238_v20 = vadd.f32 %v237_v14, %v236_v57 }
 0x58c   :  { %v300_v0 = vadd.f32 %v299_v60, %v298_v59 }
 0x58d   :  { %v311_v1 = vsel %vm216_vm4, %v310_v63, 0.0  ;;  %v239_v23 = vrot.slane %v238_v20, 1 }
 0x58e   :  { %v301_v5 = vrot.slane %v300_v0, 2  ;;  %v312_v6 = vrot.slane %v311_v1, 4 }
 0x58f   :  { %v240_v26 = vadd.f32 %v239_v23, %v238_v20 }
 0x590   :  { %v302_v8 = vadd.f32 %v301_v5, %v300_v0  ;;  %v313_v9 = vadd.f32 %v312_v6, %v311_v1 }
 0x591   :  { %v359_v31 = vsel %vm358_vm13, %v240_v26, %v639_v11 }
 0x592   :  { %v303_v2 = vrot.slane %v302_v8, 1  ;;  %v314_v16 = vrot.slane %v313_v9, 2 }
 0x594   :  { %v304_v12 = vadd.f32 %v303_v2, %v302_v8  ;;  %v315_v21 = vadd.f32 %v314_v16, %v313_v9 }
 0x596   :  { %vm318_vm12 = vcmp.eq.f32.partialorder %v304_v12, 0.0  ;;  %v316_v24 = vrot.slane %v315_v21, 1 }
 0x597   :  { %v399_v15 = vsel %vm318_vm12, 1.0, %v486_v3 }
 0x598   :  { %v321_v19 = vadd.f32 %v399_v15, %v304_v12  ;;  %v317_v27 = vadd.f32 %v316_v24, %v315_v21 }
 0x59a   :  { %458 = vrcp.f32 %v321_v19 }
 0x59b   :  { %460 = vrcp.f32 %v327_v18 }
 0x5a4   :  { %v459_v28 = vpop.eup %458 }
 0x5a5   :  { %v323_v3 = vmul.f32 %v459_v28, %v317_v27  ;;  %v461_v30 = vpop.eup %460 }
 0x5a6   :  { %v329_v32 = vmul.f32 %v461_v30, %v240_v26 }
 0x5a7   :  { %v361_v33 = vsel %vm360_vm14, %v359_v31, %v323_v3 }
 0x5a8   :  { %v363_v35 = vsel %vm362_vm15, %v361_v33, %v304_v12 }
 0x5a9   :  { %v365_v36 = vsel %vm364_vm0, %v363_v35, %v329_v32 }
 0x5aa   :  { %v367_v38 = vsel %vm366_vm1, %v365_v36, %v343_v34 }
 0x5ab   :  { %v369_v39 = vsel %vm368_vm2, %v367_v38, %v356_v37 }
 0x5ac   :  { %v371_v40 = vsel %vm370_vm3, %v369_v39, 0.0 }
 0x5ad   :  { %372 = vst.msk [vmem:[%s690_s9] sm:$0xff] %vm216_vm4, %v371_v40 }
 0x5ae   :  { %484 = dma.done.wait [#allocation3], 128  }
 0x5af   :  { %485 = vsyncadd [#allocation3], 4294967168 }
 0x5b0   :  { %390 = vsyncpa [#allocation3], 1 }

</bundles_post_ra>
